<compile_context>
chip_gen: v7x
topology: tpu7x:2x2x1
jax: 0.10.0
libtpu: 0.0.40
codegen_flags: <defaults>
</compile_context>

<pallas_src>
import jax
import jax.numpy as jnp
from jax.experimental import pallas as pl
from jax.experimental.pallas import tpu as pltpu


EPS = 1e-8
SCALE_INIT = 1.0

# Below this many bytes of coordinate data, use the fused jnp expression
# instead of launching a kernel (review item: small-N fallback).
_SMALL_FALLBACK_BYTES = 2 << 20  # 2 MiB  (~175k points at f32, D=3)


def _coors_norm_kernel(scale_ref, x_ref, o_ref):
    # scale_ref: (1,) f32 in SMEM.
    # x_ref / o_ref: (D, TILE) block in VMEM; D on sublanes, points on lanes.
    x = x_ref[...].astype(jnp.float32)            # (D, TILE)
    x2 = x * x                                    # one full-vreg VPU multiply
    sq = jnp.sum(x2, axis=0, keepdims=True)       # (1, TILE) sublane reduce -> XLU slot
    # max(sqrt(sq), eps) == sqrt(max(sq, eps^2)); fold the learned scale into
    # the EUP rsqrt so the per-element epilogue is a single VPU multiply.
    inv = scale_ref[0] * jax.lax.rsqrt(jnp.maximum(sq, EPS * EPS))  # (1, TILE)
    o_ref[...] = (x * inv).astype(o_ref.dtype)    # broadcast down the D sublanes


def _tile_and_vmem(n_lanes: int):
    """Pick a lane-tile size and a matching vmem_limit_bytes.

    VMEM accounting (review fix): a (3, TILE) f32 block is sublane-padded to 8
    sublanes, so each buffer is 8*TILE*4 bytes.  Input + output, each
    double-buffered => 4 buffers => 128*TILE bytes total.
    """
    try:
        info = pltpu.get_tpu_info()
        vmem_phys = int(getattr(info, "vmem_capacity_bytes", None) or (64 << 20))
    except Exception:  # pragma: no cover - be conservative if query fails
        vmem_phys = 64 << 20  # v7x per-core physical VMEM (smallest current gen)

    # Budget ~quarter of physical VMEM, capped at 24 MiB:
    #   v5e/v6e (128 MiB phys) -> 24 MiB budget -> TILE = 192K lanes
    #   v7x     ( 64 MiB phys) -> 16 MiB budget -> TILE = 128K lanes
    budget = min(24 << 20, vmem_phys // 4)
    tile = (budget // (4 * 8 * 4)) // 128 * 128
    tile = max(128, tile)

    # Never start a block out of bounds: cap the tile at the 128-aligned
    # floor of the lane extent (the final block may still be clipped).
    n_floor = max(128, (n_lanes // 128) * 128)
    tile = min(tile, n_floor)

    needed = 4 * 8 * tile * 4          # padded, double-buffered, in + out
    vmem_limit = needed + (4 << 20)    # small headroom for scalars/etc.
    return tile, vmem_limit


def coors_norm_lane_major(coors_dn: jax.Array, scale: jax.Array) -> jax.Array:
    """CoorsNorm on a lane-major (D, N) coordinate array — zero wrapper relayout.

    This is the preferred entry point: keep coordinates in (D, N) layout in the
    surrounding model so the kernel is a single HBM read + write pass.
    """
    D, N = coors_dn.shape
    scale = jnp.asarray(scale, jnp.float32).reshape((1,))

    # Tiny-N guard so every block starts in bounds (pads up to 128 lanes once;
    # padded zero lanes stay exactly zero after the eps clamp).
    pad_n = 128 - N if N < 128 else 0
    if pad_n:
        coors_dn = jnp.pad(coors_dn, ((0, 0), (0, pad_n)))
    n = N + pad_n

    tile, vmem_limit = _tile_and_vmem(n)
    grid = (pl.cdiv(n, tile),)

    out = pl.pallas_call(
        _coors_norm_kernel,
        out_shape=jax.ShapeDtypeStruct((D, n), coors_dn.dtype),
        grid=grid,
        in_specs=[
            pl.BlockSpec(memory_space=pltpu.MemorySpace.SMEM),  # scale, whole (1,) array
            pl.BlockSpec((D, tile), lambda i: (0, i)),          # lane tile of coors (D, N)
        ],
        out_specs=pl.BlockSpec((D, tile), lambda i: (0, i)),
        compiler_params=pltpu.CompilerParams(
            dimension_semantics=("parallel",),  # independent lane tiles
            vmem_limit_bytes=vmem_limit,
        ),
    )(scale, coors_dn)

    if pad_n:
        out = out[:, :N]
    return out


def coors_norm(coors: jax.Array, scale: jax.Array, *, force_pallas: bool = False) -> jax.Array:
    """CoorsNorm.forward for (N, D) coordinates (PyTorch layout).

    Small inputs dispatch to the fused jnp expression; large inputs go through
    the lane-major Pallas kernel (one transpose each way — see module TODO).
    """
    N, D = coors.shape
    small = N * D * jnp.dtype(coors.dtype).itemsize < _SMALL_FALLBACK_BYTES
    if small and not force_pallas:
        x = coors.astype(jnp.float32)
        norm = jnp.sqrt(jnp.sum(x * x, axis=-1, keepdims=True))
        out = x / jnp.maximum(norm, EPS) * jnp.asarray(scale, jnp.float32)
        return out.astype(coors.dtype)

    out_dn = coors_norm_lane_major(coors.T, scale)
    return out_dn.T


def coors_norm_ref(coors, scale):
    norm = jnp.linalg.norm(coors, axis=-1, keepdims=True)
    return coors / jnp.maximum(norm, EPS) * scale


if __name__ == "__main__":
    key = jax.random.PRNGKey(0)
    k1, k2, k3 = jax.random.split(key, 3)

    # Deterministic parameter init, matching torch.zeros(1).fill_(scale_init).
    scale = jnp.full((1,), SCALE_INIT, dtype=jnp.float32)

    # Case 1: tiny module-sized input (N=16 points, D=3) -> jnp fallback path.
    coors_small = jax.random.normal(k1, (16, 3), dtype=jnp.float32)
    out_small = jax.block_until_ready(coors_norm(coors_small, scale))
    assert out_small.shape == coors_small.shape and out_small.dtype == coors_small.dtype
    assert jnp.allclose(out_small, coors_norm_ref(coors_small, scale), atol=1e-5, rtol=1e-5)

    # Case 2: force the Pallas kernel, lane count an exact multiple of 128.
    coors_a = jax.random.normal(k2, (640, 3), dtype=jnp.float32)
    out_a = jax.block_until_ready(coors_norm(coors_a, scale, force_pallas=True))
    assert out_a.shape == coors_a.shape and out_a.dtype == coors_a.dtype
    assert jnp.allclose(out_a, coors_norm_ref(coors_a, scale), atol=1e-5, rtol=1e-5)

    # Case 3: force the Pallas kernel with a ragged lane count (exercises the
    # clipped final block instead of a full-array pad).
    coors_b = jax.random.normal(k3, (3000, 3), dtype=jnp.float32)
    out_b = jax.block_until_ready(coors_norm(coors_b, scale, force_pallas=True))
    assert out_b.shape == coors_b.shape and out_b.dtype == coors_b.dtype
    assert jnp.allclose(out_b, coors_norm_ref(coors_b, scale), atol=1e-5, rtol=1e-5)

    print("KERNEL_OK")
</pallas_src>

<mosaic_0001>
module attributes {stable_mosaic.version = 11 : i64} {
  func.func @_coors_norm_kernel(%arg0: i32, %arg1: memref<1xf32, #tpu.memory_space<smem>>, %arg2: memref<3x640xf32, #tpu.memory_space<vmem>>, %arg3: memref<3x640xf32, #tpu.memory_space<vmem>>) attributes {dimension_semantics = [#tpu.dimension_semantics<parallel>], iteration_bounds = array<i64: 1>, scalar_prefetch = 0 : i64, scratch_operands = 0 : i64, tpu.core_type = #tpu.core_type<tc>, window_params = [{transform_indices = @transform_0, window_bounds = array<i64: 1>}, {transform_indices = @transform_1, window_bounds = array<i64: 3, 640>}, {transform_indices = @transform_2, window_bounds = array<i64: 3, 640>}]} {
    %c0 = arith.constant 0 : index
    %c0_0 = arith.constant 0 : index
    %0 = vector.load %arg2[%c0, %c0_0] : memref<3x640xf32, #tpu.memory_space<vmem>>, vector<3x640xf32>
    %1 = arith.mulf %0, %0 : vector<3x640xf32>
    %cst = arith.constant dense<0.000000e+00> : vector<640xf32>
    %2 = vector.multi_reduction <add>, %1, %cst [0] : vector<3x640xf32> to vector<640xf32>
    %3 = vector.shape_cast %2 : vector<640xf32> to vector<1x640xf32>
    %c0_1 = arith.constant 0 : index
    %4 = memref.load %arg1[%c0_1] : memref<1xf32, #tpu.memory_space<smem>>
    %cst_2 = arith.constant 1.000000e-16 : f32
    %5 = vector.broadcast %cst_2 : f32 to vector<1x640xf32>
    %6 = arith.maximumf %3, %5 : vector<1x640xf32>
    %7 = math.rsqrt %6 : vector<1x640xf32>
    %8 = vector.broadcast %4 : f32 to vector<1x640xf32>
    %9 = arith.mulf %8, %7 : vector<1x640xf32>
    %10 = vector.broadcast %9 : vector<1x640xf32> to vector<3x640xf32>
    %11 = arith.mulf %0, %10 : vector<3x640xf32>
    %c0_3 = arith.constant 0 : index
    %c0_4 = arith.constant 0 : index
    %12 = vector.load %arg3[%c0_3, %c0_4] : memref<3x640xf32, #tpu.memory_space<vmem>>, vector<3x640xf32>
    tpu.vector_store %arg3[%c0_3, %c0_4], %11 {strides = array<i32>} : memref<3x640xf32, #tpu.memory_space<vmem>>, vector<3x640xf32>,
    return
  }
  func.func @transform_0(%arg0: i32) -> i32 {
    %c0_i32 = arith.constant 0 : i32
    %c0_i32_0 = arith.constant 0 : i32
    return %c0_i32 : i32
  }
  func.func @transform_1(%arg0: i32) -> (i32, i32) {
    %c0_i32 = arith.constant 0 : i32
    %c0_i32_0 = arith.constant 0 : i32
    return %c0_i32, %arg0 : i32, i32
  }
  func.func @transform_2(%arg0: i32) -> (i32, i32) {
    %c0_i32 = arith.constant 0 : i32
    %c0_i32_0 = arith.constant 0 : i32
    return %c0_i32, %arg0 : i32, i32
  }
}

</mosaic_0001>

<bundles_post_ra>
// kernel: tpu_custom_call.1
= control target key start
LH: loop header
LB: loop body
LE: loop exit
PB: predicated region body
PF: predicated region fallthrough
CT: control target
= control target key end

     0   :  { %8 = vsyncpa [#allocation4], 0  ;;  %s238_s0 = inlined_call_operand.<no memory space> [shape: f32[1], index: 0, kind: input, shape index: {}]   ;;  %s239_s1 = inlined_call_operand.hbm [shape: f32[3,640], index: 1, kind: input, shape index: {}]   ;;  %s240_s2 = inlined_call_operand.hbm [shape: f32[3,640], index: 2, kind: output, shape index: {}]  }
   0x1   :  { %9 = vsyncpa [#allocation5], 0  ;;  %s179_s9 = smov [#allocation3]   ;;  %s131_s13 = scalar_lea.hbm %s239_s1, 320 }
   0x2   :  { %s18_s10 = sshll.u32 %s179_s9, 4  ;;  %p132_p0 = scmp.ne.s32.totalorder %s239_s1, %s131_s13  ;;  %s19_s10 = int_to_ptr.vmem [resolvable:$true] %s18_s10 }
   0x3   :  { %p135_p1 = scmp.lt.u32.totalorder %s131_s13, %s239_s1 }
   0x5   :  { %p137_p2 = pnand %p135_p1, %p132_p0 }
   0x7   :  { %140 = shalt.err (!%p137_p2)
}
   0x8   :  { %s141_s18 = scalar_lea.vmem %s19_s10, 320  ;;  %p146_p4 = scmp.lt.s32.totalorder %s19_s10, %s19_s10 }
   0x9   :  { %p142_p3 = scmp.ne.s32.totalorder %s19_s10, %s141_s18  ;;  %p147_p5 = scmp.lt.s32.totalorder %s141_s18, %s141_s18 }
   0xb   :  { %p148_p6 = por %p147_p5, %p146_p4 }
   0xd   :  { %p149_p7 = pnand %p148_p6, %p142_p3 }
   0xf   :  { %152 = shalt.err (!%p149_p7)
}
  0x10   :  { %21 = dma.hbm_to_vmem [thread:$0]  %s239_s1, 320, %s19_s10, [#allocation4]  }
  0x11   :  { %175 = dma.done.wait [#allocation4], 320  }
  0x12   :  { %176 = vsyncadd [#allocation4], 4294966976  ;;  %vm37_vm0 = vcmask 1042432   ;;  %v208_v0 = vld [vmem:[#allocation3] sm:$0x77]  ;;  %v84_v48 = vstv %s238_s0  ;;  %s180_s22 = smov [#allocation6]  }
  0x13   :  { %v210_v1 = vld [vmem:[#allocation3 + $0x8] sm:$0x77]  ;;  %v212_v2 = vld [vmem:[#allocation3 + $0x10] sm:$0x7]  ;;  %v28_v3 = vmul.f32 %v208_v0, %v208_v0  ;;  %s110_s23 = sshll.u32 %s180_s22, 4  ;;  %s111_s23 = int_to_ptr.vmem [resolvable:$true] %s110_s23 }
  0x14   :  { %v29_v4 = vmul.f32 %v210_v1, %v210_v1  ;;  %v30_v5 = vmul.f32 %v212_v2, %v212_v2  ;;  %s153_s0 = scalar_lea.vmem %s111_s23, 320  ;;  %p158_p9 = scmp.lt.s32.totalorder %s111_s23, %s111_s23 }
  0x15   :  { %v33_v6 = vcombine.high %v28_v3, %v28_v3  ;;  %v38_v7 = vsel %vm37_vm0, %v28_v3, 0.0  ;;  %p154_p8 = scmp.ne.s32.totalorder %s111_s23, %s153_s0  ;;  %p159_p10 = scmp.lt.s32.totalorder %s153_s0, %s153_s0 }
  0x16   :  { %v34_v8 = vcombine.high %v29_v4, %v29_v4  ;;  %v52_v9 = vsel %vm37_vm0, %v29_v4, 0.0  ;;  %v39_v10 = vrot.slane %v38_v7, 4  ;;  %v66_v12 = vsel %vm37_vm0, %v30_v5, 0.0 }
  0x17   :  { %v53_v11 = vrot.slane %v52_v9, 4  ;;  %v45_v13 = vsel %vm37_vm0, %v33_v6, 0.0  ;;  %v67_v15 = vrot.slane %v66_v12, 4  ;;  %p160_p11 = por %p159_p10, %p158_p9 }
  0x18   :  { %v59_v14 = vsel %vm37_vm0, %v34_v8, 0.0  ;;  %v40_v16 = vadd.f32 %v39_v10, %v38_v7  ;;  %v46_v17 = vrot.slane %v45_v13, 4 }
  0x19   :  { %v54_v18 = vadd.f32 %v53_v11, %v52_v9  ;;  %v60_v19 = vrot.slane %v59_v14, 4  ;;  %v68_v20 = vadd.f32 %v67_v15, %v66_v12  ;;  %p161_p12 = pnand %p160_p11, %p154_p8 }
  0x1a   :  { %v41_v21 = vrot.slane %v40_v16, 2  ;;  %v47_v22 = vadd.f32 %v46_v17, %v45_v13 }
  0x1b   :  { %v55_v23 = vrot.slane %v54_v18, 2  ;;  %v61_v24 = vadd.f32 %v60_v19, %v59_v14  ;;  %v69_v25 = vrot.slane %v68_v20, 2 }
  0x1c   :  { %v42_v26 = vadd.f32 %v41_v21, %v40_v16  ;;  %v48_v27 = vrot.slane %v47_v22, 2 }
  0x1d   :  { %v56_v28 = vadd.f32 %v55_v23, %v54_v18  ;;  %v62_v29 = vrot.slane %v61_v24, 2  ;;  %v70_v30 = vadd.f32 %v69_v25, %v68_v20 }
  0x1e   :  { %v43_v31 = vrot.slane %v42_v26, 1  ;;  %v49_v32 = vadd.f32 %v48_v27, %v47_v22 }
  0x1f   :  { %v57_v33 = vrot.slane %v56_v28, 1  ;;  %v63_v34 = vadd.f32 %v62_v29, %v61_v24  ;;  %v71_v35 = vrot.slane %v70_v30, 1 }
  0x20   :  { %v44_v36 = vadd.f32 %v43_v31, %v42_v26  ;;  %v50_v37 = vrot.slane %v49_v32, 1 }
  0x21   :  { %v58_v38 = vadd.f32 %v57_v33, %v56_v28  ;;  %v64_v39 = vrot.slane %v63_v34, 1  ;;  %v72_v40 = vadd.f32 %v71_v35, %v70_v30 }
  0x22   :  { %v51_v41 = vadd.f32 %v50_v37, %v49_v32  ;;  %v74_v42 = vmax.f32 %v44_v36, 1e-16 }
  0x23   :  { %v65_v43 = vadd.f32 %v64_v39, %v63_v34  ;;  %v76_v44 = vmax.f32 %v58_v38, 1e-16  ;;  %v78_v47 = vmax.f32 %v72_v40, 1e-16 }
  0x24   :  { %v75_v45 = vmax.f32 %v51_v41, 1e-16  ;;  %121 = vrsqrt.f32 %v74_v42 }
  0x25   :  { %v77_v46 = vmax.f32 %v65_v43, 1e-16  ;;  %123 = vrsqrt.f32 %v76_v44 }
  0x26   :  { %125 = vrsqrt.f32 %v75_v45 }
  0x27   :  { %127 = vrsqrt.f32 %v77_v46 }
  0x28   :  { %129 = vrsqrt.f32 %v78_v47 }
  0x2e   :  { %v122_v49 = vpop.eup %121 }
  0x2f   :  { %v124_v50 = vpop.eup %123  ;;  %v85_v51 = vmul.f32 %v122_v49, %v84_v48 }
  0x30   :  { %v126_v52 = vpop.eup %125  ;;  %v87_v53 = vmul.f32 %v124_v50, %v84_v48 }
  0x31   :  { %v128_v54 = vpop.eup %127  ;;  %v86_v55 = vmul.f32 %v126_v52, %v84_v48 }
  0x32   :  { %v130_v56 = vpop.eup %129  ;;  %v88_v57 = vmul.f32 %v128_v54, %v84_v48 }
  0x33   :  { %v94_v58 = vcombine.low %v85_v51, %v86_v55  ;;  %v89_v59 = vmul.f32 %v130_v56, %v84_v48 }
  0x34   :  { %v95_v60 = vcombine.low %v87_v53, %v88_v57 }
  0x35   :  { %v98_v61 = vmul.f32 %v94_v58, %v208_v0  ;;  %v100_v62 = vmul.f32 %v89_v59, %v212_v2 }
  0x36   :  { %v99_v63 = vmul.f32 %v95_v60, %v210_v1 }
  0x37   :  { %101 = vst [vmem:[#allocation6] sm:$0x77] %v98_v61  ;;  %103 = vst [vmem:[#allocation6 + $0x10] sm:$0x7] %v100_v62 }
  0x38   :  { %102 = vst [vmem:[#allocation6 + $0x8] sm:$0x77] %v99_v63 }
  0x39   :  { %164 = shalt.err (!%p161_p12)
}
  0x3a   :  { %s165_s26 = scalar_lea.hbm %s240_s2, 320 }
  0x3b   :  { %p166_p13 = scmp.ne.s32.totalorder %s240_s2, %s165_s26  ;;  %p169_p0 = scmp.lt.u32.totalorder %s165_s26, %s240_s2 }
  0x3d   :  { %p171_p1 = pnand %p169_p0, %p166_p13 }
  0x3f   :  { %174 = shalt.err (!%p171_p1)
}
  0x40   :  { %113 = dma.vmem_to_hbm [thread:$0]  %s111_s23, 320, %s240_s2, [#allocation5]  }
  0x41   :  { %177 = dma.done.wait [#allocation5], 320  }
  0x42   :  { %178 = vsyncadd [#allocation5], 4294966976 }
  0x43   :  { %117 = vsyncpa [#allocation4], 1 }
  0x44   :  { %118 = vsyncpa [#allocation5], 1 }

</bundles_post_ra>
